<compile_context>
chip_gen: v7x
topology: tpu7x:2x2x1
jax: 0.10.0
libtpu: 0.0.40
codegen_flags: <defaults>
</compile_context>

<pallas_src>
import functools

import jax
import jax.numpy as jnp
from jax.experimental import pallas as pl
from jax.experimental.pallas import tpu as pltpu


def _round_up(x, m):
    return ((x + m - 1) // m) * m


def _conv_relu_kernel(x_ref, w_ref, b_ref, o_ref, *, k, wp, l_out):
    # x_ref: (1, C, Lin)    bf16  zero-padded, row-major-flattened image
    # w_ref: (k*k, TOC, C)  bf16  weight, kernel-position major
    # b_ref: (TOC, 1)       f32   (constant index_map -> DMA'd once)
    # o_ref: (1, TOC, Lout) f32   flattened (row-major over padded width) output
    #
    # Conv as k*k shifted matmuls over the flattened image: for output flat
    # position j = y*Wp + x, input flat position is j + ki*Wp + kj.  The
    # (k-1) wrap-around columns per row are garbage and cropped by the host.
    acc = None
    for ki in range(k):
        for kj in range(k):
            xs = x_ref[0, :, pl.ds(ki * wp + kj, l_out)]            # (C, Lout) bf16
            part = jnp.dot(w_ref[ki * k + kj], xs,
                           preferred_element_type=jnp.float32)       # (TOC, Lout) f32
            acc = part if acc is None else acc + part
    o_ref[0] = jnp.maximum(acc + b_ref[...], 0.0)


@functools.partial(jax.jit, static_argnames=("kernel_size", "stride", "padding"))
def fully_conv_forward(x, weight, bias, *, kernel_size, stride=1, padding=0):
    """Equivalent of FullyConv.forward: Conv2d -> ReLU -> Dropout2d(p=0)."""
    n, c, h, w = x.shape
    oc = weight.shape[0]
    k = kernel_size

    hp, wp = h + 2 * padding, w + 2 * padding
    oh1, ow1 = hp - k + 1, wp - k + 1            # stride-1 output extent

    # Flat-width trick: compute every column of the padded width, crop later.
    l_out = _round_up(oh1 * wp, 128)             # lane-dense output width
    shift_max = (k - 1) * (wp + 1)               # largest in-kernel lane offset
    l_in = _round_up(shift_max + l_out, 128)     # >= hp*wp + k - 1 (in-bounds reads)

    # Single pad+flatten of the activations (crosses HBM once, bf16).
    xp = jnp.pad(x, ((0, 0), (0, 0), (padding, padding), (padding, padding)))
    xflat = xp.reshape(n, c, hp * wp)
    xflat = jnp.pad(xflat, ((0, 0), (0, 0), (0, l_in - hp * wp))).astype(jnp.bfloat16)

    # Reorder the (small) weight, never the activations:
    # (OC, C, kH, kW) -> (kH*kW, OC, C)
    wk = jnp.transpose(weight, (2, 3, 0, 1)).reshape(k * k, oc, c).astype(jnp.bfloat16)
    b2d = bias.reshape(oc, 1).astype(jnp.float32)

    # OC tiling for the general case (keeps the resident weight block small on
    # v7x and gives the MXU 256-row tiles); the demo's OC=8 is a single tile.
    toc = 256 if (oc > 256 and oc % 256 == 0) else oc
    # TODO(synk): for very large C or images, add a C ("arbitrary") reduction
    # axis / spatial tiling so the per-step input block stays within VMEM.

    kernel = functools.partial(_conv_relu_kernel, k=k, wp=wp, l_out=l_out)
    out_flat = pl.pallas_call(
        kernel,
        out_shape=jax.ShapeDtypeStruct((n, oc, l_out), jnp.float32),
        grid=(n, oc // toc),
        in_specs=[
            pl.BlockSpec((1, c, l_in), lambda i, j: (i, 0, 0)),
            pl.BlockSpec((k * k, toc, c), lambda i, j: (0, j, 0)),
            pl.BlockSpec((toc, 1), lambda i, j: (j, 0)),
        ],
        out_specs=pl.BlockSpec((1, toc, l_out), lambda i, j: (i, j, 0)),
        compiler_params=pltpu.CompilerParams(
            dimension_semantics=("parallel", "parallel"),
            vmem_limit_bytes=48 * 1024 * 1024,
        ),
        cost_estimate=pl.CostEstimate(
            flops=2 * n * oc * c * k * k * l_out,
            transcendentals=0,
            bytes_accessed=(xflat.size * 2 + wk.size * 2 + b2d.size * 4
                            + n * oc * l_out * 4),
        ),
    )(xflat, wk, b2d)

    # (N, OC, Lout) -> crop padded-width wrap columns -> (N, OC, OH1, OW1).
    # Pure crop/reshape in natural NCHW order: no transpose.
    out = out_flat[:, :, : oh1 * wp].reshape(n, oc, oh1, wp)[:, :, :, :ow1]
    if stride > 1:
        # TODO(synk): a dedicated strided kernel would avoid this stride^2 overcompute.
        out = out[:, :, ::stride, ::stride]
    # TODO(synk): Dropout2d with p>0 in training mode is not implemented
    # (module default p=0, and eval mode is identity regardless).
    return out


def _reference_forward(x, weight, bias, *, kernel_size, stride, padding):
    y = jax.lax.conv_general_dilated(
        x.astype(jnp.float32),
        weight.astype(jnp.float32),
        window_strides=(stride, stride),
        padding=((padding, padding), (padding, padding)),
        dimension_numbers=("NCHW", "OIHW", "NCHW"),
    )
    return jnp.maximum(y + bias.reshape(1, -1, 1, 1), 0.0)


if __name__ == "__main__":
    # Small shapes consistent with the module's forward.
    N, C_IN, C_OUT, H, W = 2, 4, 8, 16, 16
    K, STRIDE, PAD = 3, 1, 1

    key = jax.random.PRNGKey(0)
    kx, kw, kb = jax.random.split(key, 3)

    x = jax.random.normal(kx, (N, C_IN, H, W), dtype=jnp.float32)
    # Deterministic init mimicking PyTorch Conv2d default (uniform in +-1/sqrt(fan_in)).
    fan_in = C_IN * K * K
    bound = 1.0 / (fan_in ** 0.5)
    weight = jax.random.uniform(kw, (C_OUT, C_IN, K, K), jnp.float32, -bound, bound)
    bias = jax.random.uniform(kb, (C_OUT,), jnp.float32, -bound, bound)

    out = fully_conv_forward(x, weight, bias, kernel_size=K, stride=STRIDE, padding=PAD)
    out = jax.block_until_ready(out)

    # Reference computed from the same bf16-rounded operands the kernel consumes,
    # so the check isolates kernel math from the (intentional) bf16 quantization.
    x_bf = x.astype(jnp.bfloat16).astype(jnp.float32)
    w_bf = weight.astype(jnp.bfloat16).astype(jnp.float32)
    ref = _reference_forward(x_bf, w_bf, bias, kernel_size=K, stride=STRIDE, padding=PAD)

    assert out.shape == (N, C_OUT, H, W), out.shape
    max_err = float(jnp.max(jnp.abs(out - ref)))
    assert jnp.allclose(out, ref, atol=2e-3, rtol=2e-3), max_err

    print("KERNEL_OK")
</pallas_src>

<mosaic_0001>
module attributes {stable_mosaic.version = 11 : i64} {
  func.func @_conv_relu_kernel(%arg0: i32, %arg1: i32, %arg2: memref<1x4x512xbf16, #tpu.memory_space<vmem>>, %arg3: memref<9x8x4xbf16, #tpu.memory_space<vmem>>, %arg4: memref<8x1xf32, #tpu.memory_space<vmem>>, %arg5: memref<1x8x384xf32, #tpu.memory_space<vmem>>) attributes {dimension_semantics = [#tpu.dimension_semantics<parallel>, #tpu.dimension_semantics<parallel>], iteration_bounds = array<i64: 2, 1>, scalar_prefetch = 0 : i64, scratch_operands = 0 : i64, tpu.core_type = #tpu.core_type<tc>, window_params = [{transform_indices = @transform_0, window_bounds = array<i64: 1, 4, 512>}, {transform_indices = @transform_1, window_bounds = array<i64: 9, 8, 4>}, {transform_indices = @transform_2, window_bounds = array<i64: 8, 1>}, {transform_indices = @transform_3, window_bounds = array<i64: 1, 8, 384>}]} {
    %c0 = arith.constant 0 : index
    %c0_0 = arith.constant 0 : index
    %c0_1 = arith.constant 0 : index
    %0 = vector.load %arg2[%c0, %c0_0, %c0_1] : memref<1x4x512xbf16, #tpu.memory_space<vmem>>, vector<1x4x384xbf16>
    %1 = vector.shape_cast %0 : vector<1x4x384xbf16> to vector<4x384xbf16>
    %c0_2 = arith.constant 0 : index
    %c0_3 = arith.constant 0 : index
    %c0_4 = arith.constant 0 : index
    %2 = vector.load %arg3[%c0_2, %c0_3, %c0_4] : memref<9x8x4xbf16, #tpu.memory_space<vmem>>, vector<1x8x4xbf16>
    %3 = vector.shape_cast %2 : vector<1x8x4xbf16> to vector<8x4xbf16>
    %cst = arith.constant dense<0.000000e+00> : vector<8x384xf32>
    %4 = tpu.matmul %3, %1, %cst {dimension_numbers = #tpu.dot_dimension_numbers<[1], [0], [0], [1], [0, 0, 1, 1], [], []>} : vector<8x4xbf16>, vector<4x384xbf16>, vector<8x384xf32> -> vector<8x384xf32>
    %c0_5 = arith.constant 0 : index
    %c0_6 = arith.constant 0 : index
    %c1 = arith.constant 1 : index
    %5 = vector.load %arg2[%c0_5, %c0_6, %c1] : memref<1x4x512xbf16, #tpu.memory_space<vmem>>, vector<1x4x384xbf16>
    %6 = vector.shape_cast %5 : vector<1x4x384xbf16> to vector<4x384xbf16>
    %c1_7 = arith.constant 1 : index
    %c0_8 = arith.constant 0 : index
    %c0_9 = arith.constant 0 : index
    %7 = vector.load %arg3[%c1_7, %c0_8, %c0_9] : memref<9x8x4xbf16, #tpu.memory_space<vmem>>, vector<1x8x4xbf16>
    %8 = vector.shape_cast %7 : vector<1x8x4xbf16> to vector<8x4xbf16>
    %cst_10 = arith.constant dense<0.000000e+00> : vector<8x384xf32>
    %9 = tpu.matmul %8, %6, %cst_10 {dimension_numbers = #tpu.dot_dimension_numbers<[1], [0], [0], [1], [0, 0, 1, 1], [], []>} : vector<8x4xbf16>, vector<4x384xbf16>, vector<8x384xf32> -> vector<8x384xf32>
    %10 = arith.addf %4, %9 : vector<8x384xf32>
    %c0_11 = arith.constant 0 : index
    %c0_12 = arith.constant 0 : index
    %c2 = arith.constant 2 : index
    %11 = vector.load %arg2[%c0_11, %c0_12, %c2] : memref<1x4x512xbf16, #tpu.memory_space<vmem>>, vector<1x4x384xbf16>
    %12 = vector.shape_cast %11 : vector<1x4x384xbf16> to vector<4x384xbf16>
    %c2_13 = arith.constant 2 : index
    %c0_14 = arith.constant 0 : index
    %c0_15 = arith.constant 0 : index
    %13 = vector.load %arg3[%c2_13, %c0_14, %c0_15] : memref<9x8x4xbf16, #tpu.memory_space<vmem>>, vector<1x8x4xbf16>
    %14 = vector.shape_cast %13 : vector<1x8x4xbf16> to vector<8x4xbf16>
    %cst_16 = arith.constant dense<0.000000e+00> : vector<8x384xf32>
    %15 = tpu.matmul %14, %12, %cst_16 {dimension_numbers = #tpu.dot_dimension_numbers<[1], [0], [0], [1], [0, 0, 1, 1], [], []>} : vector<8x4xbf16>, vector<4x384xbf16>, vector<8x384xf32> -> vector<8x384xf32>
    %16 = arith.addf %10, %15 : vector<8x384xf32>
    %c0_17 = arith.constant 0 : index
    %c0_18 = arith.constant 0 : index
    %c18 = arith.constant 18 : index
    %17 = vector.load %arg2[%c0_17, %c0_18, %c18] : memref<1x4x512xbf16, #tpu.memory_space<vmem>>, vector<1x4x384xbf16>
    %18 = vector.shape_cast %17 : vector<1x4x384xbf16> to vector<4x384xbf16>
    %c3 = arith.constant 3 : index
    %c0_19 = arith.constant 0 : index
    %c0_20 = arith.constant 0 : index
    %19 = vector.load %arg3[%c3, %c0_19, %c0_20] : memref<9x8x4xbf16, #tpu.memory_space<vmem>>, vector<1x8x4xbf16>
    %20 = vector.shape_cast %19 : vector<1x8x4xbf16> to vector<8x4xbf16>
    %cst_21 = arith.constant dense<0.000000e+00> : vector<8x384xf32>
    %21 = tpu.matmul %20, %18, %cst_21 {dimension_numbers = #tpu.dot_dimension_numbers<[1], [0], [0], [1], [0, 0, 1, 1], [], []>} : vector<8x4xbf16>, vector<4x384xbf16>, vector<8x384xf32> -> vector<8x384xf32>
    %22 = arith.addf %16, %21 : vector<8x384xf32>
    %c0_22 = arith.constant 0 : index
    %c0_23 = arith.constant 0 : index
    %c19 = arith.constant 19 : index
    %23 = vector.load %arg2[%c0_22, %c0_23, %c19] : memref<1x4x512xbf16, #tpu.memory_space<vmem>>, vector<1x4x384xbf16>
    %24 = vector.shape_cast %23 : vector<1x4x384xbf16> to vector<4x384xbf16>
    %c4 = arith.constant 4 : index
    %c0_24 = arith.constant 0 : index
    %c0_25 = arith.constant 0 : index
    %25 = vector.load %arg3[%c4, %c0_24, %c0_25] : memref<9x8x4xbf16, #tpu.memory_space<vmem>>, vector<1x8x4xbf16>
    %26 = vector.shape_cast %25 : vector<1x8x4xbf16> to vector<8x4xbf16>
    %cst_26 = arith.constant dense<0.000000e+00> : vector<8x384xf32>
    %27 = tpu.matmul %26, %24, %cst_26 {dimension_numbers = #tpu.dot_dimension_numbers<[1], [0], [0], [1], [0, 0, 1, 1], [], []>} : vector<8x4xbf16>, vector<4x384xbf16>, vector<8x384xf32> -> vector<8x384xf32>
    %28 = arith.addf %22, %27 : vector<8x384xf32>
    %c0_27 = arith.constant 0 : index
    %c0_28 = arith.constant 0 : index
    %c20 = arith.constant 20 : index
    %29 = vector.load %arg2[%c0_27, %c0_28, %c20] : memref<1x4x512xbf16, #tpu.memory_space<vmem>>, vector<1x4x384xbf16>
    %30 = vector.shape_cast %29 : vector<1x4x384xbf16> to vector<4x384xbf16>
    %c5 = arith.constant 5 : index
    %c0_29 = arith.constant 0 : index
    %c0_30 = arith.constant 0 : index
    %31 = vector.load %arg3[%c5, %c0_29, %c0_30] : memref<9x8x4xbf16, #tpu.memory_space<vmem>>, vector<1x8x4xbf16>
    %32 = vector.shape_cast %31 : vector<1x8x4xbf16> to vector<8x4xbf16>
    %cst_31 = arith.constant dense<0.000000e+00> : vector<8x384xf32>
    %33 = tpu.matmul %32, %30, %cst_31 {dimension_numbers = #tpu.dot_dimension_numbers<[1], [0], [0], [1], [0, 0, 1, 1], [], []>} : vector<8x4xbf16>, vector<4x384xbf16>, vector<8x384xf32> -> vector<8x384xf32>
    %34 = arith.addf %28, %33 : vector<8x384xf32>
    %c0_32 = arith.constant 0 : index
    %c0_33 = arith.constant 0 : index
    %c36 = arith.constant 36 : index
    %35 = vector.load %arg2[%c0_32, %c0_33, %c36] : memref<1x4x512xbf16, #tpu.memory_space<vmem>>, vector<1x4x384xbf16>
    %36 = vector.shape_cast %35 : vector<1x4x384xbf16> to vector<4x384xbf16>
    %c6 = arith.constant 6 : index
    %c0_34 = arith.constant 0 : index
    %c0_35 = arith.constant 0 : index
    %37 = vector.load %arg3[%c6, %c0_34, %c0_35] : memref<9x8x4xbf16, #tpu.memory_space<vmem>>, vector<1x8x4xbf16>
    %38 = vector.shape_cast %37 : vector<1x8x4xbf16> to vector<8x4xbf16>
    %cst_36 = arith.constant dense<0.000000e+00> : vector<8x384xf32>
    %39 = tpu.matmul %38, %36, %cst_36 {dimension_numbers = #tpu.dot_dimension_numbers<[1], [0], [0], [1], [0, 0, 1, 1], [], []>} : vector<8x4xbf16>, vector<4x384xbf16>, vector<8x384xf32> -> vector<8x384xf32>
    %40 = arith.addf %34, %39 : vector<8x384xf32>
    %c0_37 = arith.constant 0 : index
    %c0_38 = arith.constant 0 : index
    %c37 = arith.constant 37 : index
    %41 = vector.load %arg2[%c0_37, %c0_38, %c37] : memref<1x4x512xbf16, #tpu.memory_space<vmem>>, vector<1x4x384xbf16>
    %42 = vector.shape_cast %41 : vector<1x4x384xbf16> to vector<4x384xbf16>
    %c7 = arith.constant 7 : index
    %c0_39 = arith.constant 0 : index
    %c0_40 = arith.constant 0 : index
    %43 = vector.load %arg3[%c7, %c0_39, %c0_40] : memref<9x8x4xbf16, #tpu.memory_space<vmem>>, vector<1x8x4xbf16>
    %44 = vector.shape_cast %43 : vector<1x8x4xbf16> to vector<8x4xbf16>
    %cst_41 = arith.constant dense<0.000000e+00> : vector<8x384xf32>
    %45 = tpu.matmul %44, %42, %cst_41 {dimension_numbers = #tpu.dot_dimension_numbers<[1], [0], [0], [1], [0, 0, 1, 1], [], []>} : vector<8x4xbf16>, vector<4x384xbf16>, vector<8x384xf32> -> vector<8x384xf32>
    %46 = arith.addf %40, %45 : vector<8x384xf32>
    %c0_42 = arith.constant 0 : index
    %c0_43 = arith.constant 0 : index
    %c38 = arith.constant 38 : index
    %47 = vector.load %arg2[%c0_42, %c0_43, %c38] : memref<1x4x512xbf16, #tpu.memory_space<vmem>>, vector<1x4x384xbf16>
    %48 = vector.shape_cast %47 : vector<1x4x384xbf16> to vector<4x384xbf16>
    %c8 = arith.constant 8 : index
    %c0_44 = arith.constant 0 : index
    %c0_45 = arith.constant 0 : index
    %49 = vector.load %arg3[%c8, %c0_44, %c0_45] : memref<9x8x4xbf16, #tpu.memory_space<vmem>>, vector<1x8x4xbf16>
    %50 = vector.shape_cast %49 : vector<1x8x4xbf16> to vector<8x4xbf16>
    %cst_46 = arith.constant dense<0.000000e+00> : vector<8x384xf32>
    %51 = tpu.matmul %50, %48, %cst_46 {dimension_numbers = #tpu.dot_dimension_numbers<[1], [0], [0], [1], [0, 0, 1, 1], [], []>} : vector<8x4xbf16>, vector<4x384xbf16>, vector<8x384xf32> -> vector<8x384xf32>
    %52 = arith.addf %46, %51 : vector<8x384xf32>
    %c0_47 = arith.constant 0 : index
    %c0_48 = arith.constant 0 : index
    %53 = vector.load %arg4[%c0_47, %c0_48] : memref<8x1xf32, #tpu.memory_space<vmem>>, vector<8x1xf32>
    %54 = vector.broadcast %53 : vector<8x1xf32> to vector<8x384xf32>
    %55 = arith.addf %52, %54 : vector<8x384xf32>
    %cst_49 = arith.constant 0.000000e+00 : f32
    %56 = vector.broadcast %cst_49 : f32 to vector<8x384xf32>
    %57 = arith.maximumf %55, %56 : vector<8x384xf32>
    %c0_50 = arith.constant 0 : index
    %c0_51 = arith.constant 0 : index
    %c0_52 = arith.constant 0 : index
    %58 = vector.load %arg5[%c0_50, %c0_51, %c0_52] : memref<1x8x384xf32, #tpu.memory_space<vmem>>, vector<1x8x384xf32>
    %59 = vector.shape_cast %58 : vector<1x8x384xf32> to vector<8x384xf32>
    %60 = vector.shape_cast %57 : vector<8x384xf32> to vector<1x8x384xf32>
    tpu.vector_store %arg5[%c0_50, %c0_51, %c0_52], %60 {strides = array<i32>} : memref<1x8x384xf32, #tpu.memory_space<vmem>>, vector<1x8x384xf32>,
    return
  }
  func.func @transform_0(%arg0: i32, %arg1: i32) -> (i32, i32, i32) {
    %c0_i32 = arith.constant 0 : i32
    %c0_i32_0 = arith.constant 0 : i32
    %c0_i32_1 = arith.constant 0 : i32
    return %arg0, %c0_i32, %c0_i32_0 : i32, i32, i32
  }
  func.func @transform_1(%arg0: i32, %arg1: i32) -> (i32, i32, i32) {
    %c0_i32 = arith.constant 0 : i32
    %c0_i32_0 = arith.constant 0 : i32
    %c0_i32_1 = arith.constant 0 : i32
    return %c0_i32, %arg1, %c0_i32_0 : i32, i32, i32
  }
  func.func @transform_2(%arg0: i32, %arg1: i32) -> (i32, i32) {
    %c0_i32 = arith.constant 0 : i32
    %c0_i32_0 = arith.constant 0 : i32
    return %arg1, %c0_i32 : i32, i32
  }
  func.func @transform_3(%arg0: i32, %arg1: i32) -> (i32, i32, i32) {
    %c0_i32 = arith.constant 0 : i32
    %c0_i32_0 = arith.constant 0 : i32
    return %arg0, %arg1, %c0_i32 : i32, i32, i32
  }
}

</mosaic_0001>

<bundles_post_ra>
// kernel: fully_conv_forward.1
= control target key start
LH: loop header
LB: loop body
LE: loop exit
PB: predicated region body
PF: predicated region fallthrough
CT: control target
= control target key end

     0   :  { %s1716_s12 = smov 0   ;;  %s1718_s13 = smov 0   ;;  %s1873_s0 = inlined_call_operand.vmem [shape: bf16[2,4,512], index: 0, kind: input, shape index: {}]   ;;  %s1874_s1 = inlined_call_operand.vmem [shape: bf16[9,8,4], index: 1, kind: input, shape index: {}]   ;;  %s1875_s2 = inlined_call_operand.vmem [shape: f32[8,1], index: 2, kind: input, shape index: {}]   ;;  %s1876_s3 = inlined_call_operand.vmem [shape: f32[2,8,384], index: 3, kind: output, shape index: {}]  }
   0x1   :  { %s1720_s14 = smov 0  }
   0x2 LB: > { %s25_s15 = sadd.s32 1, %s1678_s13  ;;  %p1506_p0 = scmp.ge.s32.totalorder %s1682_s14, 1  ;;  %s1682_s14 = sphi %s1720_s14, %s13_s14   ;;  %s1678_s13 = sphi %s1718_s13, %s1878_s13   ;;  %s1674_s12 = sphi %s1716_s12, %s1877_s12  }
   0x3   : > { %p27_p1 = scmp.ge.s32.totalorder %s25_s15, 2  ;;  %p169_p2 = scmp.lt.s32.totalorder %s1682_s14, 3 }
   0x5   : > { %s1880_s15 = smov (%p27_p1, %s25_s15), 0  ;;  %p170_p3 = pnand %p1506_p0, %p169_p2 }
   0x6   : > { %p205_p4 = scmp.lt.s32.totalorder (!%p170_p3), %s1674_s12, 1  ;;  %v238_v0 = vlaneseq (!%p170_p3)  ;;  %v1684_v1 = vmov (!%p170_p3), 1983009808   ;;  %v1685_v5 = vmov (!%p170_p3), 0.0   ;;  %v1686_v6 = vmov (!%p170_p3), 0   ;;  %s1688_s20 = smov (!%p170_p3), 127  }
   0x7   : > { %173 = sbr.rel (%p170_p3) target bundleno = 429 (0x1ad), region = 32  ;;  %v236_v2 = vunpack.c.l.s4 (!%p170_p3), %v1684_v1  ;;  %1566 = vmatprep.subr.bf16.mxu1 (!%p170_p3), %v1685_v5  ;;  %309 = vmatprep.mubr.bf16.mxu0 (!%p170_p3), %v1686_v6  ;;  %vm1687_vm0 = vmmov (!%p170_p3), 0   ;;  %s1689_s21 = smov (!%p170_p3), 126   ;;  %v1371_v18 = vld [vmem:[%s1875_s2] sm:$0xff] (!%p170_p3)  ;;  %vm259_vm1 = vcmask (!%p170_p3), 1039360   ;;  %vm267_vm2 = vcmask (!%p170_p3), 1041408  }
   0x8   : > { %v239_v3 = vshrl.u32 (!%p170_p3), %v238_v0, 7  ;;  %1657 = vset.pattern.permute.xlu0 (!%p170_p3), %v1686_v6  ;;  %1568 = vmatprep.mubr.msk.bf16.mxu1 (!%p170_p3), %vm1687_vm0, %v1685_v5  ;;  %s1690_s22 = smov (!%p170_p3), 110   ;;  %s1691_s23 = smov (!%p170_p3), 109   ;;  %v1510_v28 = vld [vmem:[%s1874_s1 + $0x4] sm:$0xf] (!%p170_p3)  ;;  %vm263_vm3 = vcmask (!%p170_p3), 31744  }
   0x9   : > { %v237_v4 = vunpack.c.0.s8 (!%p170_p3), %v236_v2  ;;  %s1692_s24 = smov (!%p170_p3), 108   ;;  %s1693_s25 = smov (!%p170_p3), 92   ;;  %vm497_vm4 = vcmask (!%p170_p3), 1031168   ;;  %v229_v39 = vld [vmem:[%s1874_s1] sm:$0xf] (!%p170_p3)  ;;  %vm626_vm5 = vcmask (!%p170_p3), 900096  }
   0xa   : > { %s1694_s26 = smov (!%p170_p3), 91   ;;  %s1695_s27 = smov (!%p170_p3), 90   ;;  %v1517_v49 = vld [vmem:[%s1874_s1 + $0x8] sm:$0xf] (!%p170_p3)  ;;  %vm755_vm6 = vcmask (!%p170_p3), 891904   ;;  %vm884_vm7 = vcmask (!%p170_p3), 883712  }
   0xb   : > { %v240_v7 = vsub.s32 (!%p170_p3), %v237_v4, %v239_v3  ;;  %v1521_v59 = vld [vmem:[%s1874_s1 + $0xc] sm:$0xf] (!%p170_p3)  ;;  %vm1013_vm8 = vcmask (!%p170_p3), 752640   ;;  %vm1142_vm9 = vcmask (!%p170_p3), 744448   ;;  %vm1271_vm10 = vcmask (!%p170_p3), 736256  }
   0xe   : > { %s1882_s12 = smov (!%p205_p4, %s1674_s12), 1 }
   0xf   : > { %s1547_s16 = sshll.u32 %s1882_s12, 3 }
  0x10   : > { %s209_s19 = scalar_lea.vmem %s1873_s0, %s1547_s16 }
  0x11   : > { %v230_v8 = vld [vmem:[%s209_s19] sm:$0xff] }
  0x12   : > { %v228_v9 = vld [vmem:[%s209_s19] sm:$0x3f]  ;;  %v241_v10 = vrot.slane %v230_v8, %v240_v7  ;;  %v234_v11 = vcombine.high %v230_v8, %v230_v8 }
  0x13   : > { %v1745_v12 = vrot.slane %v228_v9, %v240_v7  ;;  %v359_v13 = vcombine.high %v228_v9, %v228_v9 }
  0x14   : > { %251 = vrot.lane.b32.xlu0 %v241_v10, %s1688_s20  ;;  %v249_v14 = vcombine.high %v241_v10, %v241_v10  ;;  %v248_v15 = vrot.slane %v234_v11, %v240_v7 }
  0x15   : > { %v1747_v16 = vrot.slane %v359_v13, %v240_v7  ;;  %v374_v22 = vcombine.high %v1745_v12, %v1745_v12  ;;  %v379_v31 = vsel %vm267_vm2, %v1745_v12, 0  ;;  %v1525_v7 = vld [vmem:[%s1874_s1 + $0x10] sm:$0xf] }
  0x16   : > { %255 = vrot.lane.b32.xlu1 %v248_v15, %s1688_s20  ;;  %v250_v17 = vcombine.high %v248_v15, %v248_v15 }
  0x17   : > { %v385_v33 = vsel %vm267_vm2, %v1747_v16, 0 }
  0x18   : > { %253 = vrot.lane.b32.xlu0 %v249_v14, %s1688_s20 }
  0x1a   : > { %257 = vrot.lane.b32.xlu1 %v250_v17, %s1688_s20 }
  0x1c   : > { %489 = vrot.lane.b32.xlu0 %v241_v10, %s1689_s21 }
  0x1e   : > { %491 = vrot.lane.b32.xlu1 %v249_v14, %s1689_s21 }
  0x20   : > { %493 = vrot.lane.b32.xlu0 %v248_v15, %s1689_s21 }
  0x22   : > { %495 = vrot.lane.b32.xlu1 %v250_v17, %s1689_s21 }
  0x24   : > { %618 = vrot.lane.b32.xlu0 %v241_v10, %s1690_s22 }
  0x26   : > { %620 = vrot.lane.b32.xlu1 %v249_v14, %s1690_s22 }
  0x28   : > { %622 = vrot.lane.b32.xlu0 %v248_v15, %s1690_s22 }
  0x2a   : > { %624 = vrot.lane.b32.xlu1 %v250_v17, %s1690_s22 }
  0x2c   : > { %747 = vrot.lane.b32.xlu0 %v241_v10, %s1691_s23 }
  0x2e   : > { %749 = vrot.lane.b32.xlu1 %v249_v14, %s1691_s23 }
  0x30   : > { %751 = vrot.lane.b32.xlu0 %v248_v15, %s1691_s23 }
  0x32   : > { %753 = vrot.lane.b32.xlu1 %v250_v17, %s1691_s23 }
  0x34   : > { %876 = vrot.lane.b32.xlu0 %v241_v10, %s1692_s24 }
  0x36   : > { %878 = vrot.lane.b32.xlu1 %v249_v14, %s1692_s24 }
  0x38   : > { %880 = vrot.lane.b32.xlu0 %v248_v15, %s1692_s24 }
  0x3a   : > { %882 = vrot.lane.b32.xlu1 %v250_v17, %s1692_s24 }
  0x3c   : > { %1005 = vrot.lane.b32.xlu0 %v241_v10, %s1693_s25 }
  0x3e   : > { %1007 = vrot.lane.b32.xlu1 %v249_v14, %s1693_s25 }
  0x40   : > { %1009 = vrot.lane.b32.xlu0 %v248_v15, %s1693_s25 }
  0x42   : > { %1011 = vrot.lane.b32.xlu1 %v250_v17, %s1693_s25  ;;  %s1620_s25 = smul.u32 24, %s1882_s12 }
  0x44   : > { %1134 = vrot.lane.b32.xlu0 %v241_v10, %s1694_s26  ;;  %s226_s28 = scalar_lea.vmem %s1876_s3, %s1620_s25 }
  0x46   : > { %1136 = vrot.lane.b32.xlu1 %v249_v14, %s1694_s26 }
  0x48   : > { %1138 = vrot.lane.b32.xlu0 %v248_v15, %s1694_s26 }
  0x4a   : > { %1140 = vrot.lane.b32.xlu1 %v250_v17, %s1694_s26 }
  0x4c   : > { %1263 = vrot.lane.b32.xlu0 %v241_v10, %s1695_s27 }
  0x4e   : > { %1265 = vrot.lane.b32.xlu1 %v249_v14, %s1695_s27 }
  0x50   : > { %1267 = vrot.lane.b32.xlu0 %v248_v15, %s1695_s27 }
  0x52   : > { %1269 = vrot.lane.b32.xlu1 %v250_v17, %s1695_s27  ;;  %v1529_v17 = vld [vmem:[%s1874_s1 + $0x14] sm:$0xf] }
  0x54   : > { %1374 = vperm.xlu0 %1657, %v1371_v18  }
  0x86   : > { %v252_v19 = vpop.permute.xlu0 %251 }
  0x88   : > { %v256_v20 = vpop.permute.xlu1 %255 }
  0x8a   : > { %v254_v21 = vpop.permute.xlu0 %253 }
  0x8b   : > { %v261_v23 = vsel %vm259_vm1, %v254_v21, %v256_v20  ;;  %v260_v24 = vsel %vm259_vm1, %v252_v19, %v254_v21 }
  0x8c   : > { %1511 = vmatprep.subr.msk.bf16.mxu0 %vm267_vm2, %v261_v23  ;;  %v258_v25 = vpop.permute.xlu1 %257  ;;  %v269_v26 = vsel %vm267_vm2, %v260_v24, 0 }
  0x8d   : > { %278 = vmatpush1.bf16.msra.mxu0 %v269_v26  ;;  %v262_v27 = vsel %vm259_vm1, %v256_v20, %v258_v25 }
  0x8e   : > { %v275_v29 = vsel %vm267_vm2, %v262_v27, 0  ;;  %v490_v30 = vpop.permute.xlu0 %489  ;;  %1514 = vmatprep.subr.msk.bf16.mxu0 %vm267_vm2, %v374_v22  ;;  %v1533_v27 = vld [vmem:[%s1874_s1 + $0x18] sm:$0xf] }
  0x8f   : > { %1567 = vmatpush3.bf16.msra.mxu1 %v275_v29 }
  0x90   : > { %1512 = vmatmul.mubr.msk.bf16.vlgmr.msra.gmra.mrb[0].mxu0 %vm263_vm3, %v1510_v28  ;;  %1572 = vmatprep.subr.bf16.mxu1 %v1685_v5  ;;  %v492_v32 = vpop.permute.xlu1 %491 }
  0x91   : > { %388 = vmatpush1.bf16.msra.mxu0 %v379_v31  ;;  %419 = vmatprep.mubr.bf16.mxu0 %v1686_v6  ;;  %v498_v35 = vsel %vm497_vm4, %v490_v30, %v492_v32 }
  0x92   : > { %1569 = vmatmul.mubr.msk.bf16.vlgmr.msra.gmra.mrb[0].mxu1 %vm263_vm3, %v1510_v28  ;;  %v494_v34 = vpop.permute.xlu0 %493  ;;  %v505_v40 = vsel %vm267_vm2, %v498_v35, 0 }
  0x93   : > { %1573 = vmatpush3.bf16.msra.mxu1 %v385_v33  ;;  %v499_v36 = vsel %vm497_vm4, %v492_v32, %v494_v34  ;;  %1574 = vmatprep.mubr.msk.bf16.mxu1 %vm1687_vm0, %v1685_v5 }
  0x94   : > { %1518 = vmatprep.subr.msk.bf16.mxu0 %vm267_vm2, %v499_v36  ;;  %v496_v37 = vpop.permute.xlu1 %495  ;;  %1578 = vmatprep.subr.bf16.mxu1 %v1685_v5 }
  0x95   : > { %v500_v38 = vsel %vm497_vm4, %v494_v34, %v496_v37  ;;  %v1537_v37 = vld [vmem:[%s1874_s1 + $0x1c] sm:$0xf] }
  0x96   : > { %v619_v41 = vpop.permute.xlu0 %618  ;;  %v511_v42 = vsel %vm267_vm2, %v500_v38, 0 }
  0x98   : > { %1515 = vmatmul.mubr.msk.bf16.vlgmr.msra.gmra.mrb[4].mxu0 %vm263_vm3, %v229_v39  ;;  %v621_v43 = vpop.permute.xlu1 %620 }
  0x99   : > { %514 = vmatpush1.bf16.msra.mxu0 %v505_v40  ;;  %545 = vmatprep.mubr.bf16.mxu0 %v1686_v6  ;;  %v627_v45 = vsel %vm626_vm5, %v619_v41, %v621_v43  ;;  %v1541_v40 = vld [vmem:[%s1874_s1 + $0x20] sm:$0xf] }
  0x9a   : > { %1575 = vmatmul.mubr.msk.bf16.vlgmr.msra.gmra.mrb[4].mxu1 %vm263_vm3, %v229_v39  ;;  %v623_v44 = vpop.permute.xlu0 %622  ;;  %v634_v50 = vsel %vm267_vm2, %v627_v45, 0 }
  0x9b   : > { %1579 = vmatpush3.bf16.msra.mxu1 %v511_v42  ;;  %v628_v46 = vsel %vm626_vm5, %v621_v43, %v623_v44  ;;  %1580 = vmatprep.mubr.msk.bf16.mxu1 %vm1687_vm0, %v1685_v5 }
  0x9c   : > { %1522 = vmatprep.subr.msk.bf16.mxu0 %vm267_vm2, %v628_v46  ;;  %v625_v47 = vpop.permute.xlu1 %624  ;;  %1584 = vmatprep.subr.bf16.mxu1 %v1685_v5 }
  0x9d   : > { %v629_v48 = vsel %vm626_vm5, %v623_v44, %v625_v47 }
  0x9e   : > { %v748_v51 = vpop.permute.xlu0 %747  ;;  %v640_v52 = vsel %vm267_vm2, %v629_v48, 0 }
  0xa0   : > { %1519 = vmatmul.mubr.msk.bf16.vlgmr.msra.gmra.mrb[8].mxu0 %vm263_vm3, %v1517_v49  ;;  %v750_v53 = vpop.permute.xlu1 %749 }
  0xa1   : > { %643 = vmatpush1.bf16.msra.mxu0 %v634_v50  ;;  %674 = vmatprep.mubr.bf16.mxu0 %v1686_v6  ;;  %v756_v55 = vsel %vm755_vm6, %v748_v51, %v750_v53 }
  0xa2   : > { %1581 = vmatmul.mubr.msk.bf16.vlgmr.msra.gmra.mrb[8].mxu1 %vm263_vm3, %v1517_v49  ;;  %v752_v54 = vpop.permute.xlu0 %751  ;;  %v763_v60 = vsel %vm267_vm2, %v756_v55, 0 }
  0xa3   : > { %1585 = vmatpush3.bf16.msra.mxu1 %v640_v52  ;;  %v757_v56 = vsel %vm755_vm6, %v750_v53, %v752_v54  ;;  %1586 = vmatprep.mubr.msk.bf16.mxu1 %vm1687_vm0, %v1685_v5 }
  0xa4   : > { %1526 = vmatprep.subr.msk.bf16.mxu0 %vm267_vm2, %v757_v56  ;;  %v754_v57 = vpop.permute.xlu1 %753  ;;  %1590 = vmatprep.subr.bf16.mxu1 %v1685_v5 }
  0xa5   : > { %v758_v58 = vsel %vm755_vm6, %v752_v54, %v754_v57 }
  0xa6   : > { %v877_v61 = vpop.permute.xlu0 %876  ;;  %v769_v62 = vsel %vm267_vm2, %v758_v58, 0 }
  0xa8   : > { %1523 = vmatmul.mubr.msk.bf16.vlgmr.msra.gmra.mrb[12].mxu0 %vm263_vm3, %v1521_v59  ;;  %v879_v63 = vpop.permute.xlu1 %878 }
  0xa9   : > { %772 = vmatpush1.bf16.msra.mxu0 %v763_v60  ;;  %803 = vmatprep.mubr.bf16.mxu0 %v1686_v6  ;;  %v885_v1 = vsel %vm884_vm7, %v877_v61, %v879_v63 }
  0xaa   : > { %1587 = vmatmul.mubr.msk.bf16.vlgmr.msra.gmra.mrb[12].mxu1 %vm263_vm3, %v1521_v59  ;;  %v881_v0 = vpop.permute.xlu0 %880  ;;  %v892_v8 = vsel %vm267_vm2, %v885_v1, 0 }
  0xab   : > { %1591 = vmatpush3.bf16.msra.mxu1 %v769_v62  ;;  %v886_v2 = vsel %vm884_vm7, %v879_v63, %v881_v0  ;;  %1592 = vmatprep.mubr.msk.bf16.mxu1 %vm1687_vm0, %v1685_v5 }
  0xac   : > { %1530 = vmatprep.subr.msk.bf16.mxu0 %vm267_vm2, %v886_v2  ;;  %v883_v3 = vpop.permute.xlu1 %882  ;;  %1596 = vmatprep.subr.bf16.mxu1 %v1685_v5 }
  0xad   : > { %v887_v4 = vsel %vm884_vm7, %v881_v0, %v883_v3 }
  0xae   : > { %v1006_v9 = vpop.permute.xlu0 %1005  ;;  %v898_v10 = vsel %vm267_vm2, %v887_v4, 0 }
  0xb0   : > { %1527 = vmatmul.mubr.msk.bf16.vlgmr.msra.gmra.mrb[16].mxu0 %vm263_vm3, %v1525_v7  ;;  %v1008_v11 = vpop.permute.xlu1 %1007 }
  0xb1   : > { %901 = vmatpush1.bf16.msra.mxu0 %v892_v8  ;;  %932 = vmatprep.mubr.bf16.mxu0 %v1686_v6  ;;  %v1014_v13 = vsel %vm1013_vm8, %v1006_v9, %v1008_v11 }
  0xb2   : > { %1593 = vmatmul.mubr.msk.bf16.vlgmr.msra.gmra.mrb[16].mxu1 %vm263_vm3, %v1525_v7  ;;  %v1010_v12 = vpop.permute.xlu0 %1009  ;;  %v1021_v18 = vsel %vm267_vm2, %v1014_v13, 0 }
  0xb3   : > { %1597 = vmatpush3.bf16.msra.mxu1 %v898_v10  ;;  %v1015_v14 = vsel %vm1013_vm8, %v1008_v11, %v1010_v12  ;;  %1598 = vmatprep.mubr.msk.bf16.mxu1 %vm1687_vm0, %v1685_v5 }
  0xb4   : > { %1534 = vmatprep.subr.msk.bf16.mxu0 %vm267_vm2, %v1015_v14  ;;  %v1012_v15 = vpop.permute.xlu1 %1011  ;;  %1602 = vmatprep.subr.bf16.mxu1 %v1685_v5 }
  0xb5   : > { %v1016_v16 = vsel %vm1013_vm8, %v1010_v12, %v1012_v15 }
  0xb6   : > { %v1135_v19 = vpop.permute.xlu0 %1134  ;;  %v1027_v20 = vsel %vm267_vm2, %v1016_v16, 0 }
  0xb8   : > { %1531 = vmatmul.mubr.msk.bf16.vlgmr.msra.gmra.mrb[20].mxu0 %vm263_vm3, %v1529_v17  ;;  %v1137_v21 = vpop.permute.xlu1 %1136 }
  0xb9   : > { %1030 = vmatpush1.bf16.msra.mxu0 %v1021_v18  ;;  %1061 = vmatprep.mubr.bf16.mxu0 %v1686_v6  ;;  %v1143_v23 = vsel %vm1142_vm9, %v1135_v19, %v1137_v21 }
  0xba   : > { %1599 = vmatmul.mubr.msk.bf16.vlgmr.msra.gmra.mrb[20].mxu1 %vm263_vm3, %v1529_v17  ;;  %v1139_v22 = vpop.permute.xlu0 %1138  ;;  %v1150_v28 = vsel %vm267_vm2, %v1143_v23, 0 }
  0xbb   : > { %1603 = vmatpush3.bf16.msra.mxu1 %v1027_v20  ;;  %v1144_v24 = vsel %vm1142_vm9, %v1137_v21, %v1139_v22  ;;  %1604 = vmatprep.mubr.msk.bf16.mxu1 %vm1687_vm0, %v1685_v5 }
  0xbc   : > { %1538 = vmatprep.subr.msk.bf16.mxu0 %vm267_vm2, %v1144_v24  ;;  %v1141_v25 = vpop.permute.xlu1 %1140  ;;  %1608 = vmatprep.subr.bf16.mxu1 %v1685_v5 }
  0xbd   : > { %v1145_v26 = vsel %vm1142_vm9, %v1139_v22, %v1141_v25 }
  0xbe   : > { %v1264_v29 = vpop.permute.xlu0 %1263  ;;  %v1156_v30 = vsel %vm267_vm2, %v1145_v26, 0 }
  0xc0   : > { %1535 = vmatmul.mubr.msk.bf16.vlgmr.msra.gmra.mrb[24].mxu0 %vm263_vm3, %v1533_v27  ;;  %v1266_v31 = vpop.permute.xlu1 %1265 }
  0xc1   : > { %1159 = vmatpush1.bf16.msra.mxu0 %v1150_v28  ;;  %1190 = vmatprep.mubr.bf16.mxu0 %v1686_v6  ;;  %v1272_v33 = vsel %vm1271_vm10, %v1264_v29, %v1266_v31 }
  0xc2   : > { %1605 = vmatmul.mubr.msk.bf16.vlgmr.msra.gmra.mrb[24].mxu1 %vm263_vm3, %v1533_v27  ;;  %v1268_v32 = vpop.permute.xlu0 %1267  ;;  %v1279_v38 = vsel %vm267_vm2, %v1272_v33, 0 }
  0xc3   : > { %1609 = vmatpush3.bf16.msra.mxu1 %v1156_v30  ;;  %v1273_v34 = vsel %vm1271_vm10, %v1266_v31, %v1268_v32  ;;  %1610 = vmatprep.mubr.msk.bf16.mxu1 %vm1687_vm0, %v1685_v5 }
  0xc4   : > { %1542 = vmatprep.subr.msk.bf16.mxu0 %vm267_vm2, %v1273_v34  ;;  %v1270_v35 = vpop.permute.xlu1 %1269  ;;  %1614 = vmatprep.subr.bf16.mxu1 %v1685_v5 }
  0xc5   : > { %v1274_v36 = vsel %vm1271_vm10, %v1268_v32, %v1270_v35 }
  0xc6   : > { %v1285_v39 = vsel %vm267_vm2, %v1274_v36, 0 }
  0xc8   : > { %1539 = vmatmul.mubr.msk.bf16.vlgmr.msra.gmra.mrb[28].mxu0 %vm263_vm3, %v1537_v37 }
  0xc9   : > { %1288 = vmatpush1.bf16.msra.mxu0 %v1279_v38  ;;  %1319 = vmatprep.mubr.bf16.mxu0 %v1686_v6 }
  0xca   : > { %1611 = vmatmul.mubr.msk.bf16.vlgmr.msra.gmra.mrb[28].mxu1 %vm263_vm3, %v1537_v37 }
  0xcb   : > { %1615 = vmatpush3.bf16.msra.mxu1 %v1285_v39  ;;  %1616 = vmatprep.mubr.msk.bf16.mxu1 %vm1687_vm0, %v1685_v5 }
  0xd0   : > { %1543 = vmatmul.mubr.msk.bf16.vlgmr.msra.gmra.mrb[32].mxu0 %vm263_vm3, %v1541_v40 }
  0xd2   : > { %1617 = vmatmul.mubr.msk.bf16.vlgmr.msra.gmra.mrb[32].mxu1 %vm263_vm3, %v1541_v40 }
 0x163   : > { %v311_v41 = vpop.f32.mrb[0].mxu0 }
 0x164   : > { %v313_v42 = vpop.f32.mrb[1].mxu0 }
 0x165   : > { %v315_v43 = vpop.f32.mrb[2].mxu0  ;;  %v352_v44 = vpop.f32.mrb[0].mxu1 }
 0x166   : > { %v316_v45 = vpop.f32.mrb[3].mxu0  ;;  %v1570_v6 = vpop.f32.mrb[1].mxu1 }
 0x167   : > { %v355_v46 = vpop.f32.mrb[2].mxu1 }
 0x168   : > { %v1571_v47 = vpop.f32.mrb[3].mxu1 }
 0x16b   : > { %v421_v48 = vpop.f32.mrb[4].mxu0 }
 0x16c   : > { %v422_v49 = vadd.f32 %v421_v48, %v311_v41  ;;  %v423_v50 = vpop.f32.mrb[5].mxu0 }
 0x16d   : > { %v424_v5 = vadd.f32 %v423_v50, %v313_v42  ;;  %v425_v51 = vpop.f32.mrb[6].mxu0  ;;  %v462_v52 = vpop.f32.mrb[4].mxu1 }
 0x16e   : > { %v463_v53 = vadd.f32 %v462_v52, %v352_v44  ;;  %v426_v54 = vpop.f32.mrb[7].mxu0  ;;  %v1576_v55 = vpop.f32.mrb[5].mxu1 }
 0x16f   : > { %v465_v56 = vpop.f32.mrb[6].mxu1 }
 0x170   : > { %v1577_v57 = vpop.f32.mrb[7].mxu1 }
 0x173   : > { %v547_v58 = vpop.f32.mrb[8].mxu0 }
 0x174   : > { %v594_v59 = vadd.f32 %v547_v58, %v422_v49  ;;  %v549_v60 = vpop.f32.mrb[9].mxu0 }
 0x175   : > { %v595_v61 = vadd.f32 %v549_v60, %v424_v5  ;;  %v551_v62 = vpop.f32.mrb[10].mxu0  ;;  %v588_v63 = vpop.f32.mrb[8].mxu1 }
 0x176   : > { %v596_v0 = vadd.f32 %v588_v63, %v463_v53  ;;  %v552_v1 = vpop.f32.mrb[11].mxu0  ;;  %v1582_v2 = vpop.f32.mrb[9].mxu1 }
 0x177   : > { %v591_v3 = vpop.f32.mrb[10].mxu1 }
 0x178   : > { %v1583_v4 = vpop.f32.mrb[11].mxu1 }
 0x17b   : > { %v676_v7 = vpop.f32.mrb[12].mxu0 }
 0x17c   : > { %v723_v8 = vadd.f32 %v676_v7, %v594_v59  ;;  %v678_v9 = vpop.f32.mrb[13].mxu0 }
 0x17d   : > { %v724_v10 = vadd.f32 %v678_v9, %v595_v61  ;;  %v680_v11 = vpop.f32.mrb[14].mxu0  ;;  %v717_v12 = vpop.f32.mrb[12].mxu1 }
 0x17e   : > { %v725_v13 = vadd.f32 %v717_v12, %v596_v0  ;;  %v681_v14 = vpop.f32.mrb[15].mxu0  ;;  %v1588_v15 = vpop.f32.mrb[13].mxu1 }
 0x17f   : > { %v720_v16 = vpop.f32.mrb[14].mxu1  ;;  %v1375_v61 = vpop.permute.xlu0 %1374 }
 0x180   : > { %v1589_v17 = vpop.f32.mrb[15].mxu1 }
 0x183   : > { %v805_v18 = vpop.f32.mrb[16].mxu0 }
 0x184   : > { %v852_v19 = vadd.f32 %v805_v18, %v723_v8  ;;  %v807_v20 = vpop.f32.mrb[17].mxu0 }
 0x185   : > { %v853_v21 = vadd.f32 %v807_v20, %v724_v10  ;;  %v809_v22 = vpop.f32.mrb[18].mxu0  ;;  %v846_v23 = vpop.f32.mrb[16].mxu1 }
 0x186   : > { %v854_v24 = vadd.f32 %v846_v23, %v725_v13  ;;  %v810_v25 = vpop.f32.mrb[19].mxu0  ;;  %v1594_v26 = vpop.f32.mrb[17].mxu1 }
 0x187   : > { %v849_v27 = vpop.f32.mrb[18].mxu1 }
 0x188   : > { %v1595_v28 = vpop.f32.mrb[19].mxu1 }
 0x18b   : > { %v934_v29 = vpop.f32.mrb[20].mxu0 }
 0x18c   : > { %v981_v30 = vadd.f32 %v934_v29, %v852_v19  ;;  %v936_v31 = vpop.f32.mrb[21].mxu0 }
 0x18d   : > { %v982_v32 = vadd.f32 %v936_v31, %v853_v21  ;;  %v938_v33 = vpop.f32.mrb[22].mxu0  ;;  %v975_v34 = vpop.f32.mrb[20].mxu1 }
 0x18e   : > { %v983_v35 = vadd.f32 %v975_v34, %v854_v24  ;;  %v939_v36 = vpop.f32.mrb[23].mxu0  ;;  %v1600_v37 = vpop.f32.mrb[21].mxu1 }
 0x18f   : > { %v978_v38 = vpop.f32.mrb[22].mxu1 }
 0x190   : > { %v1601_v39 = vpop.f32.mrb[23].mxu1 }
 0x193   : > { %v1063_v40 = vpop.f32.mrb[24].mxu0 }
 0x194   : > { %v1110_v41 = vadd.f32 %v1063_v40, %v981_v30  ;;  %v1065_v42 = vpop.f32.mrb[25].mxu0 }
 0x195   : > { %v1111_v43 = vadd.f32 %v1065_v42, %v982_v32  ;;  %v1067_v44 = vpop.f32.mrb[26].mxu0  ;;  %v1104_v45 = vpop.f32.mrb[24].mxu1 }
 0x196   : > { %v1112_v6 = vadd.f32 %v1104_v45, %v983_v35  ;;  %v1068_v46 = vpop.f32.mrb[27].mxu0  ;;  %v1606_v47 = vpop.f32.mrb[25].mxu1 }
 0x197   : > { %v1107_v48 = vpop.f32.mrb[26].mxu1 }
 0x198   : > { %v1607_v49 = vpop.f32.mrb[27].mxu1 }
 0x19b   : > { %v1192_v50 = vpop.f32.mrb[28].mxu0 }
 0x19c   : > { %v1239_v5 = vadd.f32 %v1192_v50, %v1110_v41  ;;  %v1194_v51 = vpop.f32.mrb[29].mxu0 }
 0x19d   : > { %v1240_v52 = vadd.f32 %v1194_v51, %v1111_v43  ;;  %v1196_v53 = vpop.f32.mrb[30].mxu0  ;;  %v1233_v54 = vpop.f32.mrb[28].mxu1 }
 0x19e   : > { %v1241_v55 = vadd.f32 %v1233_v54, %v1112_v6  ;;  %v1197_v56 = vpop.f32.mrb[31].mxu0  ;;  %v1612_v57 = vpop.f32.mrb[29].mxu1 }
 0x19f   : > { %v1236_v58 = vpop.f32.mrb[30].mxu1 }
 0x1a0   : > { %v1613_v59 = vpop.f32.mrb[31].mxu1 }
 0x1a3   : > { %v1321_v60 = vpop.f32.mrb[32].mxu0 }
 0x1a4   : > { %v1368_v62 = vadd.f32 %v1321_v60, %v1239_v5  ;;  %v1323_v63 = vpop.f32.mrb[33].mxu0 }
 0x1a5   : > { %v1369_v0 = vadd.f32 %v1323_v63, %v1240_v52  ;;  %v1325_v1 = vpop.f32.mrb[34].mxu0  ;;  %v1362_v2 = vpop.f32.mrb[32].mxu1 }
 0x1a6   : > { %v1377_v3 = vadd.f32 %v1375_v61, %v1368_v62  ;;  %v1370_v4 = vadd.f32 %v1362_v2, %v1241_v55  ;;  %v1326_v7 = vpop.f32.mrb[35].mxu0  ;;  %v1618_v8 = vpop.f32.mrb[33].mxu1 }
 0x1a7   : > { %v1378_v9 = vadd.f32 %v1375_v61, %v1369_v0  ;;  %v1365_v10 = vpop.f32.mrb[34].mxu1 }
 0x1a8   : > { %v1380_v11 = vmax.f32 %v1377_v3, 0.0  ;;  %v1379_v12 = vadd.f32 %v1375_v61, %v1370_v4  ;;  %v1619_v13 = vpop.f32.mrb[35].mxu1 }
 0x1a9   : > { %v1381_v14 = vmax.f32 %v1378_v9, 0.0 }
 0x1aa   : > { %1383 = vst [vmem:[%s226_s28] sm:$0xff] %v1380_v11  ;;  %v1382_v15 = vmax.f32 %v1379_v12, 0.0 }
 0x1ab   : > { %1384 = vst [vmem:[%s226_s28 + $0x8] sm:$0xff] %v1381_v14 }
 0x1ac   : > { %1385 = vst [vmem:[%s226_s28 + $0x10] sm:$0xff] %v1382_v15 }
 0x1ad PF: > { %s13_s14 = sadd.s32 1, %s1682_s14   ;;  %s1877_s12 = smov %s1678_s13 }
 0x1ae   : > { %p10_p5 = scmp.ge.s32.totalorder %s13_s14, 4   ;;  %s1878_s13 = smov %s1880_s15 }
 0x1b0   :  { %12 = sbr.rel (!%p10_p5) target bundleno = 2 (0x2), region = 76 }

</bundles_post_ra>
